<compile_context>
chip_gen: v7x
topology: tpu7x:2x2x1
jax: 0.10.0
libtpu: 0.0.40
codegen_flags: <defaults>
</compile_context>

<pallas_src>
import numpy as np
import jax
import jax.numpy as jnp
from jax.experimental import pallas as pl
from jax.experimental.pallas import tpu as pltpu

# ---- model config (small, consistent with a GPT-2-like `h` stack) ----------
VOCAB = 64
H = 32            # true hidden size of the module
HP = 128          # lane-padded hidden size used inside the kernel
FFN = 4 * H       # mlp intermediate (= 128, already lane-dense)
N_LAYERS = 2
BATCH = 2
SEQ = 8
T = BATCH * SEQ   # 16 tokens -> one sublane-aligned tile

DTYPE = jnp.float32
WDTYPE = jnp.bfloat16   # matmul operand dtype (accumulation stays f32)


# ---------------------------------------------------------------------------
# Fused Pallas kernel: embedding-perturb + all blocks + per-block perturb
# ---------------------------------------------------------------------------
def _fused_forward_kernel(x_ref, w1_ref, b1_ref, w2_ref, b2_ref,
                          mask_ref, val_ref, emb_mask_ref, emb_val_ref,
                          o_ref, x_sc):
    li = pl.program_id(0)

    @pl.when(li == 0)
    def _():
        # model.drop output wrapped by PerturbedLayer('embedding'):
        #   x[..., coords] = values   ==   x*(1-m) + v   (v == 0 off-mask)
        x0 = x_ref[...]
        x_sc[...] = x0 * (1.0 - emb_mask_ref[...]) + emb_val_ref[...]

    x = x_sc[...]                                    # [T, HP] f32, VMEM-resident carry

    # block li: y = x + W2(gelu(W1 x + b1)) + b2   (bf16 MXU, f32 accumulate)
    h1 = jnp.dot(x.astype(WDTYPE), w1_ref[...],
                 preferred_element_type=jnp.float32) + b1_ref[...]
    h1 = jax.nn.gelu(h1)     # TODO(synk): use approximate=False to bit-match torch nn.GELU(erf)
    y = jnp.dot(h1.astype(WDTYPE), w2_ref[...],
                preferred_element_type=jnp.float32) + b2_ref[...] + x

    # PerturbedLayer for block li: out[..., coords] = values
    y = y * (1.0 - mask_ref[...]) + val_ref[...]
    x_sc[...] = y

    @pl.when(li == pl.num_programs(0) - 1)
    def _():
        o_ref[...] = y.astype(o_ref.dtype)


def fused_forward_pallas(x, w1, b1, w2, b2, masks, vals, emb_mask, emb_val):
    """x: [T, HP] f32; w1/w2: [L, HP, FFN]/[L, FFN, HP] bf16; rest f32."""
    return pl.pallas_call(
        _fused_forward_kernel,
        out_shape=jax.ShapeDtypeStruct((T, HP), DTYPE),
        grid=(N_LAYERS,),
        in_specs=[
            pl.BlockSpec((T, HP), lambda li: (0, 0)),              # x0 (resident)
            pl.BlockSpec((None, HP, FFN), lambda li: (li, 0, 0)),  # W1[li]
            pl.BlockSpec((None, 1, FFN), lambda li: (li, 0, 0)),   # b1[li]
            pl.BlockSpec((None, FFN, HP), lambda li: (li, 0, 0)),  # W2[li]
            pl.BlockSpec((None, 1, HP), lambda li: (li, 0, 0)),    # b2[li]
            pl.BlockSpec((None, 1, HP), lambda li: (li, 0, 0)),    # mask[li]
            pl.BlockSpec((None, 1, HP), lambda li: (li, 0, 0)),    # values[li]
            pl.BlockSpec((1, HP), lambda li: (0, 0)),              # embedding mask
            pl.BlockSpec((1, HP), lambda li: (0, 0)),              # embedding values
        ],
        out_specs=pl.BlockSpec((T, HP), lambda li: (0, 0)),
        scratch_shapes=[pltpu.VMEM((T, HP), jnp.float32)],         # activation carry
        compiler_params=pltpu.CompilerParams(
            # layer axis carries the accumulator -> must be sequential
            dimension_semantics=("arbitrary",)),
    )(x, w1, b1, w2, b2, masks, vals, emb_mask, emb_val)


# ---------------------------------------------------------------------------
# PerturbedModel (JAX/Pallas version)
# ---------------------------------------------------------------------------
def _pad_last(a, target):
    pad = target - a.shape[-1]
    cfg = [(0, 0)] * (a.ndim - 1) + [(0, pad)]
    return jnp.pad(a, cfg)


class PerturbedModelPallas:
    def __init__(self, params, perturbation_coordinates, perturbation_values=None):
        perturbation_coordinates = np.asarray(perturbation_coordinates)
        if perturbation_values is None:
            perturbation_values = np.zeros(len(perturbation_coordinates))
        perturbation_values = np.asarray(perturbation_values)
        assert len(perturbation_values) == len(perturbation_coordinates), \
            'perturbation_values must match perturbation_coordinates'
        assert np.all(perturbation_coordinates[:, 1] >= 0) and \
               np.all(perturbation_coordinates[:, 1] < H), 'hidden coord out of range'
        assert np.all(perturbation_coordinates[:, 0] >= 0) and \
               np.all(perturbation_coordinates[:, 0] <= N_LAYERS), 'layer index out of range'

        # Per-layer lane masks / value vectors (numpy advanced assignment gives
        # last-write-wins, matching torch `out[..., coords] = values`).
        emb_mask = np.zeros((1, HP), dtype=np.float32)
        emb_val = np.zeros((1, HP), dtype=np.float32)
        masks = np.zeros((N_LAYERS, 1, HP), dtype=np.float32)
        vals = np.zeros((N_LAYERS, 1, HP), dtype=np.float32)
        for l_ix in np.unique(perturbation_coordinates[:, 0]):
            sel = perturbation_coordinates[:, 0] == l_ix
            coords = perturbation_coordinates[sel][:, 1].astype(np.int64)
            values = perturbation_values[sel].astype(np.float32)
            if l_ix == 0:                       # model.drop (embedding) output
                emb_mask[0, coords] = 1.0
                emb_val[0, coords] = values
            else:                               # block (l_ix - 1) output
                masks[int(l_ix) - 1, 0, coords] = 1.0
                vals[int(l_ix) - 1, 0, coords] = values
        self.emb_mask = jnp.asarray(emb_mask)
        self.emb_val = jnp.asarray(emb_val)
        self.masks = jnp.asarray(masks)
        self.vals = jnp.asarray(vals)

        # Lane-pad embeddings/weights to HP; padded lanes stay exactly zero.
        self.wte = _pad_last(params['wte'], HP)                       # [V, HP] f32
        self.wpe = _pad_last(params['wpe'], HP)                       # [S, HP] f32
        # W1: pad input (hidden) axis; W2/b2: pad output (hidden) axis.
        self.w1 = jnp.pad(params['w1'], ((0, 0), (0, HP - H), (0, 0))).astype(WDTYPE)
        self.b1 = params['b1'].astype(DTYPE)                          # [L, 1, FFN]
        self.w2 = _pad_last(params['w2'], HP).astype(WDTYPE)          # [L, FFN, HP]
        self.b2 = _pad_last(params['b2'], HP).astype(DTYPE)           # [L, 1, HP]

    def forward(self, input_ids):
        B, S = input_ids.shape
        # token + position embedding (glue); `drop` is identity at eval.
        x = jnp.take(self.wte, input_ids, axis=0) + self.wpe[None, :S, :]
        x = x.reshape(B * S, HP).astype(DTYPE)
        y = fused_forward_pallas(x, self.w1, self.b1, self.w2, self.b2,
                                 self.masks, self.vals, self.emb_mask, self.emb_val)
        return y[:, :H].reshape(B, S, H)


# Pure-JAX reference (same bf16 matmul / f32 elementwise recipe).
def reference_forward(model, input_ids):
    B, S = input_ids.shape
    x = jnp.take(model.wte, input_ids, axis=0) + model.wpe[None, :S, :]
    x = x.reshape(B * S, HP).astype(DTYPE)
    x = x * (1.0 - model.emb_mask) + model.emb_val
    for li in range(N_LAYERS):
        h1 = jnp.dot(x.astype(WDTYPE), model.w1[li],
                     preferred_element_type=jnp.float32) + model.b1[li]
        h1 = jax.nn.gelu(h1)
        y = jnp.dot(h1.astype(WDTYPE), model.w2[li],
                    preferred_element_type=jnp.float32) + model.b2[li] + x
        y = y * (1.0 - model.masks[li]) + model.vals[li]
        x = y
    return x[:, :H].reshape(B, S, H)


if __name__ == "__main__":
    key = jax.random.PRNGKey(0)
    ks = jax.random.split(key, 8)

    params = {
        'wte': jax.random.normal(ks[0], (VOCAB, H), DTYPE) * 0.02,
        'wpe': jax.random.normal(ks[1], (SEQ, H), DTYPE) * 0.02,
        'w1': jax.random.normal(ks[2], (N_LAYERS, H, FFN), DTYPE) * 0.05,
        'b1': jax.random.normal(ks[3], (N_LAYERS, 1, FFN), DTYPE) * 0.01,
        'w2': jax.random.normal(ks[4], (N_LAYERS, FFN, H), DTYPE) * 0.05,
        'b2': jax.random.normal(ks[5], (N_LAYERS, 1, H), DTYPE) * 0.01,
    }

    # perturbation_coordinates: [layer_index, hidden_coordinate]
    # layer 0 -> embedding/drop output, layer k -> block k-1 output.
    perturbation_coordinates = np.array([
        [0, 3], [0, 7],      # embedding output, coords 3 and 7
        [1, 0], [1, 5],      # block 0 output, coords 0 and 5
        [2, 31],             # block 1 output, coord 31
    ])
    perturbation_values = np.array([1.0, -2.0, 0.5, 3.0, -1.5])

    model = PerturbedModelPallas(params, perturbation_coordinates, perturbation_values)

    input_ids = jax.random.randint(ks[6], (BATCH, SEQ), 0, VOCAB)

    out = model.forward(input_ids)
    out = jax.block_until_ready(out)

    ref = reference_forward(model, input_ids)
    np.testing.assert_allclose(np.asarray(out), np.asarray(ref), rtol=1e-4, atol=1e-4)

    # perturbed coordinates of the final layer must equal the values exactly
    np.testing.assert_allclose(np.asarray(out[..., 31]), -1.5, rtol=0, atol=0)

    print("KERNEL_OK")
</pallas_src>

<mosaic_0001>
module attributes {stable_mosaic.version = 11 : i64} {
  func.func @_fused_forward_kernel(%arg0: i32, %arg1: memref<16x128xf32, #tpu.memory_space<vmem>>, %arg2: memref<1x128x128xbf16, #tpu.memory_space<vmem>>, %arg3: memref<1x1x128xf32, #tpu.memory_space<vmem>>, %arg4: memref<1x128x128xbf16, #tpu.memory_space<vmem>>, %arg5: memref<1x1x128xf32, #tpu.memory_space<vmem>>, %arg6: memref<1x1x128xf32, #tpu.memory_space<vmem>>, %arg7: memref<1x1x128xf32, #tpu.memory_space<vmem>>, %arg8: memref<1x128xf32, #tpu.memory_space<vmem>>, %arg9: memref<1x128xf32, #tpu.memory_space<vmem>>, %arg10: memref<16x128xf32, #tpu.memory_space<vmem>>, %arg11: memref<16x128xf32, #tpu.memory_space<vmem>>) attributes {dimension_semantics = [#tpu.dimension_semantics<arbitrary>], iteration_bounds = array<i64: 2>, scalar_prefetch = 0 : i64, scratch_operands = 1 : i64, tpu.core_type = #tpu.core_type<tc>, window_params = [{pipeline_mode = #tpu.pipeline_mode<synchronous>, transform_indices = @transform_0, window_bounds = array<i64: 16, 128>}, {transform_indices = @transform_1, window_bounds = array<i64: 1, 128, 128>}, {transform_indices = @transform_2, window_bounds = array<i64: 1, 1, 128>}, {transform_indices = @transform_3, window_bounds = array<i64: 1, 128, 128>}, {transform_indices = @transform_4, window_bounds = array<i64: 1, 1, 128>}, {transform_indices = @transform_5, window_bounds = array<i64: 1, 1, 128>}, {transform_indices = @transform_6, window_bounds = array<i64: 1, 1, 128>}, {pipeline_mode = #tpu.pipeline_mode<synchronous>, transform_indices = @transform_7, window_bounds = array<i64: 1, 128>}, {pipeline_mode = #tpu.pipeline_mode<synchronous>, transform_indices = @transform_8, window_bounds = array<i64: 1, 128>}, {pipeline_mode = #tpu.pipeline_mode<synchronous>, transform_indices = @transform_9, window_bounds = array<i64: 16, 128>}]} {
    %c0_i32 = arith.constant 0 : i32
    %0 = arith.cmpi eq, %arg0, %c0_i32 : i32
    %1 = arith.extui %0 : i1 to i32
    %c0_i32_0 = arith.constant 0 : i32
    %2 = arith.cmpi ne, %1, %c0_i32_0 : i32
    scf.if %2 {
      %c0_29 = arith.constant 0 : index
      %c0_30 = arith.constant 0 : index
      %48 = vector.load %arg1[%c0_29, %c0_30] : memref<16x128xf32, #tpu.memory_space<vmem>>, vector<16x128xf32>
      %c0_31 = arith.constant 0 : index
      %c0_32 = arith.constant 0 : index
      %49 = vector.load %arg8[%c0_31, %c0_32] : memref<1x128xf32, #tpu.memory_space<vmem>>, vector<1x128xf32>
      %cst_33 = arith.constant 1.000000e+00 : f32
      %50 = vector.broadcast %cst_33 : f32 to vector<1x128xf32>
      %51 = arith.subf %50, %49 : vector<1x128xf32>
      %52 = vector.broadcast %51 : vector<1x128xf32> to vector<16x128xf32>
      %53 = arith.mulf %48, %52 : vector<16x128xf32>
      %c0_34 = arith.constant 0 : index
      %c0_35 = arith.constant 0 : index
      %54 = vector.load %arg9[%c0_34, %c0_35] : memref<1x128xf32, #tpu.memory_space<vmem>>, vector<1x128xf32>
      %55 = vector.broadcast %54 : vector<1x128xf32> to vector<16x128xf32>
      %56 = arith.addf %53, %55 : vector<16x128xf32>
      %c0_36 = arith.constant 0 : index
      %c0_37 = arith.constant 0 : index
      %57 = vector.load %arg11[%c0_36, %c0_37] : memref<16x128xf32, #tpu.memory_space<vmem>>, vector<16x128xf32>
      tpu.vector_store %arg11[%c0_36, %c0_37], %56 {strides = array<i32>} : memref<16x128xf32, #tpu.memory_space<vmem>>, vector<16x128xf32>,
    } else {
    }
    %c0 = arith.constant 0 : index
    %c0_1 = arith.constant 0 : index
    %3 = vector.load %arg11[%c0, %c0_1] : memref<16x128xf32, #tpu.memory_space<vmem>>, vector<16x128xf32>
    %4 = arith.truncf %3 : vector<16x128xf32> to vector<16x128xbf16>
    %c0_2 = arith.constant 0 : index
    %c0_3 = arith.constant 0 : index
    %c0_4 = arith.constant 0 : index
    %5 = vector.load %arg2[%c0_2, %c0_3, %c0_4] : memref<1x128x128xbf16, #tpu.memory_space<vmem>>, vector<1x128x128xbf16>
    %6 = vector.shape_cast %5 : vector<1x128x128xbf16> to vector<128x128xbf16>
    %cst = arith.constant dense<0.000000e+00> : vector<16x128xf32>
    %7 = tpu.matmul %4, %6, %cst {dimension_numbers = #tpu.dot_dimension_numbers<[1], [0], [0], [1], [0, 0, 1, 1], [], []>} : vector<16x128xbf16>, vector<128x128xbf16>, vector<16x128xf32> -> vector<16x128xf32>
    %c0_5 = arith.constant 0 : index
    %c0_6 = arith.constant 0 : index
    %c0_7 = arith.constant 0 : index
    %8 = vector.load %arg3[%c0_5, %c0_6, %c0_7] : memref<1x1x128xf32, #tpu.memory_space<vmem>>, vector<1x1x128xf32>
    %9 = vector.shape_cast %8 : vector<1x1x128xf32> to vector<1x128xf32>
    %10 = vector.broadcast %9 : vector<1x128xf32> to vector<16x128xf32>
    %11 = arith.addf %7, %10 : vector<16x128xf32>
    %12 = arith.mulf %11, %11 : vector<16x128xf32>
    %13 = arith.mulf %11, %12 : vector<16x128xf32>
    %cst_8 = arith.constant 4.471500e-02 : f32
    %14 = vector.broadcast %cst_8 : f32 to vector<16x128xf32>
    %15 = arith.mulf %14, %13 : vector<16x128xf32>
    %16 = arith.addf %11, %15 : vector<16x128xf32>
    %cst_9 = arith.constant 0.797884583 : f32
    %17 = vector.broadcast %cst_9 : f32 to vector<16x128xf32>
    %18 = arith.mulf %17, %16 : vector<16x128xf32>
    %19 = math.tanh %18 : vector<16x128xf32>
    %cst_10 = arith.constant 1.000000e+00 : f32
    %20 = vector.broadcast %cst_10 : f32 to vector<16x128xf32>
    %21 = arith.addf %20, %19 : vector<16x128xf32>
    %cst_11 = arith.constant 5.000000e-01 : f32
    %22 = vector.broadcast %cst_11 : f32 to vector<16x128xf32>
    %23 = arith.mulf %22, %21 : vector<16x128xf32>
    %24 = arith.mulf %11, %23 : vector<16x128xf32>
    %25 = arith.truncf %24 : vector<16x128xf32> to vector<16x128xbf16>
    %c0_12 = arith.constant 0 : index
    %c0_13 = arith.constant 0 : index
    %c0_14 = arith.constant 0 : index
    %26 = vector.load %arg4[%c0_12, %c0_13, %c0_14] : memref<1x128x128xbf16, #tpu.memory_space<vmem>>, vector<1x128x128xbf16>
    %27 = vector.shape_cast %26 : vector<1x128x128xbf16> to vector<128x128xbf16>
    %cst_15 = arith.constant dense<0.000000e+00> : vector<16x128xf32>
    %28 = tpu.matmul %25, %27, %cst_15 {dimension_numbers = #tpu.dot_dimension_numbers<[1], [0], [0], [1], [0, 0, 1, 1], [], []>} : vector<16x128xbf16>, vector<128x128xbf16>, vector<16x128xf32> -> vector<16x128xf32>
    %c0_16 = arith.constant 0 : index
    %c0_17 = arith.constant 0 : index
    %c0_18 = arith.constant 0 : index
    %29 = vector.load %arg5[%c0_16, %c0_17, %c0_18] : memref<1x1x128xf32, #tpu.memory_space<vmem>>, vector<1x1x128xf32>
    %30 = vector.shape_cast %29 : vector<1x1x128xf32> to vector<1x128xf32>
    %31 = vector.broadcast %30 : vector<1x128xf32> to vector<16x128xf32>
    %32 = arith.addf %28, %31 : vector<16x128xf32>
    %33 = arith.addf %32, %3 : vector<16x128xf32>
    %c0_19 = arith.constant 0 : index
    %c0_20 = arith.constant 0 : index
    %c0_21 = arith.constant 0 : index
    %34 = vector.load %arg6[%c0_19, %c0_20, %c0_21] : memref<1x1x128xf32, #tpu.memory_space<vmem>>, vector<1x1x128xf32>
    %35 = vector.shape_cast %34 : vector<1x1x128xf32> to vector<1x128xf32>
    %cst_22 = arith.constant 1.000000e+00 : f32
    %36 = vector.broadcast %cst_22 : f32 to vector<1x128xf32>
    %37 = arith.subf %36, %35 : vector<1x128xf32>
    %38 = vector.broadcast %37 : vector<1x128xf32> to vector<16x128xf32>
    %39 = arith.mulf %33, %38 : vector<16x128xf32>
    %c0_23 = arith.constant 0 : index
    %c0_24 = arith.constant 0 : index
    %c0_25 = arith.constant 0 : index
    %40 = vector.load %arg7[%c0_23, %c0_24, %c0_25] : memref<1x1x128xf32, #tpu.memory_space<vmem>>, vector<1x1x128xf32>
    %41 = vector.shape_cast %40 : vector<1x1x128xf32> to vector<1x128xf32>
    %42 = vector.broadcast %41 : vector<1x128xf32> to vector<16x128xf32>
    %43 = arith.addf %39, %42 : vector<16x128xf32>
    %c0_26 = arith.constant 0 : index
    %c0_27 = arith.constant 0 : index
    %44 = vector.load %arg11[%c0_26, %c0_27] : memref<16x128xf32, #tpu.memory_space<vmem>>, vector<16x128xf32>
    tpu.vector_store %arg11[%c0_26, %c0_27], %43 {strides = array<i32>} : memref<16x128xf32, #tpu.memory_space<vmem>>, vector<16x128xf32>,
    %c1_i32 = arith.constant 1 : i32
    %45 = arith.cmpi eq, %arg0, %c1_i32 : i32
    %46 = arith.extui %45 : i1 to i32
    %c0_i32_28 = arith.constant 0 : i32
    %47 = arith.cmpi ne, %46, %c0_i32_28 : i32
    scf.if %47 {
      %c0_29 = arith.constant 0 : index
      %c0_30 = arith.constant 0 : index
      %48 = vector.load %arg10[%c0_29, %c0_30] : memref<16x128xf32, #tpu.memory_space<vmem>>, vector<16x128xf32>
      tpu.vector_store %arg10[%c0_29, %c0_30], %43 {strides = array<i32>} : memref<16x128xf32, #tpu.memory_space<vmem>>, vector<16x128xf32>,
    } else {
    }
    return
  }
  func.func @transform_0(%arg0: i32) -> (i32, i32) {
    %c0_i32 = arith.constant 0 : i32
    %c0_i32_0 = arith.constant 0 : i32
    %c0_i32_1 = arith.constant 0 : i32
    return %c0_i32, %c0_i32_0 : i32, i32
  }
  func.func @transform_1(%arg0: i32) -> (i32, i32, i32) {
    %c0_i32 = arith.constant 0 : i32
    %c0_i32_0 = arith.constant 0 : i32
    %c0_i32_1 = arith.constant 0 : i32
    return %arg0, %c0_i32, %c0_i32_0 : i32, i32, i32
  }
  func.func @transform_2(%arg0: i32) -> (i32, i32, i32) {
    %c0_i32 = arith.constant 0 : i32
    %c0_i32_0 = arith.constant 0 : i32
    %c0_i32_1 = arith.constant 0 : i32
    return %arg0, %c0_i32, %c0_i32_0 : i32, i32, i32
  }
  func.func @transform_3(%arg0: i32) -> (i32, i32, i32) {
    %c0_i32 = arith.constant 0 : i32
    %c0_i32_0 = arith.constant 0 : i32
    %c0_i32_1 = arith.constant 0 : i32
    return %arg0, %c0_i32, %c0_i32_0 : i32, i32, i32
  }
  func.func @transform_4(%arg0: i32) -> (i32, i32, i32) {
    %c0_i32 = arith.constant 0 : i32
    %c0_i32_0 = arith.constant 0 : i32
    %c0_i32_1 = arith.constant 0 : i32
    return %arg0, %c0_i32, %c0_i32_0 : i32, i32, i32
  }
  func.func @transform_5(%arg0: i32) -> (i32, i32, i32) {
    %c0_i32 = arith.constant 0 : i32
    %c0_i32_0 = arith.constant 0 : i32
    %c0_i32_1 = arith.constant 0 : i32
    return %arg0, %c0_i32, %c0_i32_0 : i32, i32, i32
  }
  func.func @transform_6(%arg0: i32) -> (i32, i32, i32) {
    %c0_i32 = arith.constant 0 : i32
    %c0_i32_0 = arith.constant 0 : i32
    %c0_i32_1 = arith.constant 0 : i32
    return %arg0, %c0_i32, %c0_i32_0 : i32, i32, i32
  }
  func.func @transform_7(%arg0: i32) -> (i32, i32) {
    %c0_i32 = arith.constant 0 : i32
    %c0_i32_0 = arith.constant 0 : i32
    %c0_i32_1 = arith.constant 0 : i32
    return %c0_i32, %c0_i32_0 : i32, i32
  }
  func.func @transform_8(%arg0: i32) -> (i32, i32) {
    %c0_i32 = arith.constant 0 : i32
    %c0_i32_0 = arith.constant 0 : i32
    %c0_i32_1 = arith.constant 0 : i32
    return %c0_i32, %c0_i32_0 : i32, i32
  }
  func.func @transform_9(%arg0: i32) -> (i32, i32) {
    %c0_i32 = arith.constant 0 : i32
    %c0_i32_0 = arith.constant 0 : i32
    %c0_i32_1 = arith.constant 0 : i32
    return %c0_i32, %c0_i32_0 : i32, i32
  }
}

</mosaic_0001>

<bundles_post_ra>
// kernel: tpu_custom_call.1
= control target key start
LH: loop header
LB: loop body
LE: loop exit
PB: predicated region body
PF: predicated region fallthrough
CT: control target
= control target key end

     0   :  { %14 = vsyncpa [#allocation4], 0  ;;  %s1585_s0 = inlined_call_operand.hbm [shape: f32[16,128], index: 0, kind: input, shape index: {}]   ;;  %s1586_s1 = inlined_call_operand.hbm [shape: bf16[2,128,128], index: 1, kind: input, shape index: {}]   ;;  %s1587_s2 = inlined_call_operand.vmem [shape: f32[2,1,128], index: 2, kind: input, shape index: {}]   ;;  %s1588_s3 = inlined_call_operand.hbm [shape: bf16[2,128,128], index: 3, kind: input, shape index: {}]   ;;  %s1589_s4 = inlined_call_operand.vmem [shape: f32[2,1,128], index: 4, kind: input, shape index: {}]   ;;  %s1590_s5 = inlined_call_operand.vmem [shape: f32[2,1,128], index: 5, kind: input, shape index: {}]   ;;  %s1591_s6 = inlined_call_operand.vmem [shape: f32[2,1,128], index: 6, kind: input, shape index: {}]   ;;  %s1592_s7 = inlined_call_operand.vmem [shape: f32[1,128], index: 7, kind: input, shape index: {}]   ;;  %s1593_s8 = inlined_call_operand.vmem [shape: f32[1,128], index: 8, kind: input, shape index: {}]   ;;  %s1594_s9 = inlined_call_operand.hbm [shape: f32[16,128], index: 9, kind: output, shape index: {}]  }
   0x1   :  { %15 = vsyncpa [#allocation7], 0 }
   0x2   :  { %17 = vsyncpa [#allocation7 + $0x1], 0 }
   0x3   :  { %18 = vsyncpa [#allocation5], 0  ;;  %s1287_s30 = smov 0   ;;  %s1289_s10 = smov 0  }
   0x4   :  { %s1291_s11 = smov 0   ;;  %s1293_s12 = smov 0  }
   0x5 LB: > { %s1308_s13 = sadd.s32 1, %s1223_s12   ;;  %s52_s14 = sadd.s32 1, %s1219_s11  ;;  %s1223_s12 = sphi %s1293_s12, %s1612_s12   ;;  %s1219_s11 = sphi %s1291_s11, %s1611_s11   ;;  %s1215_s10 = sphi %s1289_s10, %s1610_s10   ;;  %s1211_s30 = sphi %s1287_s30, %s1609_s30  }
   0x6   : > { %s49_s15 = ssub.s32 %s1223_s12, %s1308_s13  ;;  %p59_p0 = scmp.ne.s32.totalorder %s1219_s11, %s1215_s10 }
   0x7   : > { %p50_p1 = scmp.eq.s32.totalorder %s49_s15, 0  ;;  %p60_p2 = scmp.eq.s32.totalorder %s1223_s12, 0 }
   0x8   : > { %p1001_p3 = scmp.lt.s32.totalorder %s1223_s12, 2  ;;  %s301_s17 = sand.u32 1, %s1223_s12  }
   0x9   : > { %s1318_s16 = scalar_select %p50_p1, %s1219_s11, %s52_s14  }
   0xa   : > { %p61_p4 = por %p60_p2, %p59_p0  ;;  %s303_s18 = sand.u32 1, %s1219_s11  }
   0xb   : > { %s1322_s19 = sshll.u32 %s303_s18, 6  ;;  %s917_s20 = sshll.u32 %s1223_s12, 10 }
   0xc   : > { %s1330_s23 = scalar_lea.hbm %s1586_s1, %s917_s20  ;;  %s305_s24 = scalar_lea.vmem [#allocation6], %s1322_s19 }
   0xd   : > { %s312_s25 = sshll.u32 %s305_s24, 4  ;;  %p1333_p5 = pnand %p1001_p3, %p61_p4  ;;  %s1337_s25 = int_to_ptr.vmem [resolvable:$true] %s312_s25 }
   0xe   : > { %s1339_s27 = scalar_lea.sflag [#allocation7], %s301_s17  ;;  %s1067_s28 = scalar_lea.hbm %s1330_s23, 1024 }
   0xf   : > { %p1068_p6 = scmp.ne.s32.totalorder %s1330_s23, %s1067_s28  ;;  %p1069_p7 = pneg %p1333_p5 }
  0x10   : > { %s1072_s15 = scalar_lea.hbm %s1586_s1, 2048  ;;  %p1073_p10 = scmp.lt.u32.totalorder %s1330_s23, %s1586_s1 }
  0x11   : > { %p1070_p8 = pnand %p1069_p7, %p1068_p6  ;;  %p1074_p11 = scmp.lt.u32.totalorder %s1072_s15, %s1067_s28 }
  0x12   : > { %p1076_p13 = scmp.lt.u32.totalorder %s1067_s28, %s1330_s23 }
  0x13   : > { %p1071_p9 = pneg %p1070_p8  ;;  %p1075_p12 = por %p1074_p11, %p1073_p10 }
  0x15   : > { %p1077_p0 = por %p1076_p13, %p1075_p12 }
  0x17   : > { %p1078_p1 = pnand %p1077_p0, %p1071_p9 }
  0x19   : > { %1081 = shalt.err (!%p1078_p1)
}
  0x1a   : > { %s1082_s17 = scalar_lea.vmem %s1337_s25, 1024  ;;  %s1225_s22 = smov [#allocation6]  }
  0x1b   : > { %p1083_p2 = scmp.ne.s32.totalorder %s1337_s25, %s1082_s17  ;;  %s1087_s24 = sshll.u32 %s1225_s22, 4  ;;  %s1088_s24 = int_to_ptr.vmem [resolvable:$false] %s1087_s24 }
  0x1c   : > { %s1089_s29 = scalar_lea.vmem %s1088_s24, 2048  ;;  %p1090_p6 = scmp.lt.s32.totalorder %s1337_s25, %s1088_s24 }
  0x1d   : > { %p1085_p3 = pnand %p1083_p2, %p1069_p7  ;;  %p1091_p8 = scmp.lt.s32.totalorder %s1089_s29, %s1082_s17 }
  0x1f   : > { %p1086_p4 = pneg %p1085_p3  ;;  %p1092_p10 = por %p1091_p8, %p1090_p6 }
  0x21   : > { %p1093_p11 = pnand %p1092_p10, %p1086_p4 }
  0x23   : > { %1096 = shalt.err (!%p1093_p11)
}
  0x24   : > { %s1226_s28 = smov 64   ;;  %s1227_s14 = smov 4  }
  0x25   : > { %996 = dma.hbm_to_vmem [thread:$0]  (!%p1333_p5), %s1330_s23, 1024, %s1337_s25, %s1339_s27, %s1226_s28, %s1226_s28, %s1227_s14  }
  0x26   : > { %s1375_s21 = scalar_lea.hbm %s1588_s3, %s917_s20  ;;  %s332_s17 = scalar_lea.vmem [#allocation8], %s1322_s19 }
  0x27   : > { %s339_s22 = sshll.u32 %s332_s17, 4  ;;  %s1381_s24 = sadd.s32 4294967295, %s1223_s12   ;;  %s1378_s22 = int_to_ptr.vmem [resolvable:$true] %s339_s22 }
  0x28   : > { %p65_p9 = scmp.ne.s32.totalorder %s1215_s10, %s1211_s30  ;;  %p1595_p12 = scmp.eq.s32.totalorder %s1381_s24, 0 }
  0x29   : > { %p878_p13 = scmp.ge.s32.totalorder %s1223_s12, 1  ;;  %p269_p0 = scmp.lt.s32.totalorder %s1223_s12, 3 }
  0x2a   : > { %p1391_p2 = por %p1595_p12, %p65_p9  ;;  %s1228_s23 = smov [#allocation3]  }
  0x2b   : > { %p1395_p3 = pnand %p878_p13, %p269_p0  ;;  %s281_s25 = sshll.u32 %s1228_s23, 4  ;;  %s1399_s25 = int_to_ptr.vmem [resolvable:$true] %s281_s25 }
  0x2c   : > { %s1599_s19 = scalar_select %p1391_p2, 1, 0 }
  0x2d   : > { %s1600_s20 = scalar_select %p1395_p3, 1, 0 }
  0x2e   : > { %s1097_s30 = scalar_lea.hbm %s1375_s21, 1024  ;;  %s1102_s15 = scalar_lea.hbm %s1588_s3, 2048 }
  0x2f   : > { %p1098_p6 = scmp.ne.s32.totalorder %s1375_s21, %s1097_s30  ;;  %p1103_p11 = scmp.lt.u32.totalorder %s1375_s21, %s1588_s3 }
  0x30   : > { %p1104_p9 = scmp.lt.u32.totalorder %s1102_s15, %s1097_s30  ;;  %p1106_p0 = scmp.lt.u32.totalorder %s1097_s30, %s1375_s21 }
  0x31   : > { %p1100_p8 = pnand %p1098_p6, %p1069_p7 }
  0x32   : > { %p1105_p13 = por %p1104_p9, %p1103_p11 }
  0x33   : > { %p1101_p10 = pneg %p1100_p8 }
  0x34   : > { %p1107_p1 = por %p1106_p0, %p1105_p13 }
  0x36   : > { %p1108_p12 = pnand %p1107_p1, %p1101_p10 }
  0x38   : > { %1111 = shalt.err (!%p1108_p12)
}
  0x39   : > { %s1112_s23 = scalar_lea.vmem %s1378_s22, 1024  ;;  %s1229_s12 = smov [#allocation8]  }
  0x3a   : > { %p1113_p6 = scmp.ne.s32.totalorder %s1378_s22, %s1112_s23  ;;  %s1117_s29 = sshll.u32 %s1229_s12, 4  ;;  %s1118_s29 = int_to_ptr.vmem [resolvable:$false] %s1117_s29 }
  0x3b   : > { %s1119_s18 = scalar_lea.vmem %s1118_s29, 2048  ;;  %p1120_p2 = scmp.lt.s32.totalorder %s1378_s22, %s1118_s29 }
  0x3c   : > { %p1115_p8 = pnand %p1113_p6, %p1069_p7  ;;  %p1121_p11 = scmp.lt.s32.totalorder %s1119_s18, %s1112_s23 }
  0x3e   : > { %p1116_p4 = pneg %p1115_p8  ;;  %p1122_p9 = por %p1121_p11, %p1120_p2 }
  0x40   : > { %p1123_p13 = pnand %p1122_p9, %p1116_p4 }
  0x42   : > { %1126 = shalt.err (!%p1123_p13)
}
  0x43   : > { %999 = dma.hbm_to_vmem [thread:$0]  (!%p1333_p5), %s1375_s21, 1024, %s1378_s22, %s1339_s27, %s1226_s28, %s1226_s28, %s1227_s14  }
  0x44   : > { %p1601_p7 = scmp.eq.s32.totalorder %s1381_s24, 0  ;;  %p1602_p12 = pneg %p1395_p3 }
  0x45   : > { %s1127_s26 = scalar_lea.hbm %s1585_s0, 256 }
  0x46   : > { %p1435_p1 = pnand %p1602_p12, %p1601_p7  ;;  %p1128_p2 = scmp.ne.s32.totalorder %s1585_s0, %s1127_s26 }
  0x47   : > { %p1134_p0 = scmp.lt.u32.totalorder %s1127_s26, %s1585_s0 }
  0x48   : > { %p1129_p4 = pneg %p1435_p1 }
  0x4a   : > { %p1130_p10 = pnand %p1129_p4, %p1128_p2 }
  0x4c   : > { %p1131_p5 = pneg %p1130_p10 }
  0x4e   : > { %p1136_p6 = pnand %p1134_p0, %p1131_p5 }
  0x50   : > { %1139 = shalt.err (!%p1136_p6)
}
  0x51   : > { %s1140_s14 = scalar_lea.vmem %s1399_s25, 256  ;;  %p1148_p13 = scmp.lt.s32.totalorder %s1399_s25, %s1399_s25 }
  0x52   : > { %p1141_p8 = scmp.ne.s32.totalorder %s1399_s25, %s1140_s14  ;;  %p1149_p7 = scmp.lt.s32.totalorder %s1140_s14, %s1140_s14 }
  0x54   : > { %p1143_p11 = pnand %p1141_p8, %p1129_p4  ;;  %p1150_p12 = por %p1149_p7, %p1148_p13 }
  0x56   : > { %p1144_p9 = pneg %p1143_p11 }
  0x58   : > { %p1151_p3 = pnand %p1150_p12, %p1144_p9 }
  0x5a   : > { %1154 = shalt.err (!%p1151_p3)
}
  0x5b   : > { %s1230_s21 = smov 128   ;;  %s1231_s22 = smov 8  }
  0x5c   : > { %992 = dma.hbm_to_vmem [thread:$0]  (!%p1435_p1), %s1585_s0, 256, %s1399_s25, [#allocation4], %s1230_s21, %s1230_s21, %s1231_s22  }
  0x5d   : > { %p1604_p2 = scmp.ne.s32.totalorder %s1600_s20, 0 }
  0x5e   : > { %p1605_p4 = scmp.eq.s32.totalorder (!%p1604_p2), %s1381_s24, 0 }
  0x5f   : > { %369 = sbr.rel (%p1604_p2) target bundleno = 651 (0x28b), region = 56 }
  0x66   : > { %1198 = dma.done.wait (%p1605_p4), [#allocation4], 256   ;;  %p1606_p10 = pmov %p1605_p4 }
  0x67   : > { %s375_s15 = sand.u32 1, %s1381_s24   ;;  %s377_s17 = sand.u32 1, %s1215_s10  }
  0x68   : > { %1200 = vsyncadd (%p1606_p10), [#allocation4], 4294967040  ;;  %s889_s26 = sshll.u32 %s377_s17, 6  ;;  %s376_s30 = scalar_lea.sflag [#allocation7], %s375_s15 }
  0x69   : > { %s1468_s23 = scalar_lea.vmem [#allocation6], %s889_s26  ;;  %p1607_p3 = scmp.ne.s32.totalorder %s1599_s19, 0 }
  0x6b   : > { %1202 = dma.done.wait (%p1607_p3), %s376_s30, 2048  }
  0x6c   : > { %1204 = vsyncadd (%p1607_p3), %s376_s30, 4294965248  ;;  %p435_p1 = scmp.lt.s32.totalorder %s1381_s24, 1  ;;  %s1494_s30 = scalar_lea.vmem [#allocation8], %s889_s26 }
  0x6d   : > { %p1608_p5 = scmp.ne.s32.totalorder %s1381_s24, 0 }
  0x6e   : > { %s1476_s20 = scalar_select %p435_p1, %s1381_s24, 1 }
  0x6f   : > { %451 = sbr.rel (%p1608_p5) target bundleno = 124 (0x7c), region = 72  ;;  %v454_v0 = vld [vmem:[%s1592_s7] sm:$0x1] (!%p1608_p5)  ;;  %v457_v1 = vlaneseq (!%p1608_p5)  ;;  %v452_v5 = vld [vmem:[#allocation3] sm:$0xff] (!%p1608_p5)  ;;  %v453_v6 = vld [vmem:[#allocation3 + $0x8] sm:$0xff] (!%p1608_p5) }
  0x70   : > { %s437_s27 = scalar_lea.vmem %s1587_s2, %s1476_s20  ;;  %s440_s21 = scalar_lea.vmem %s1589_s4, %s1476_s20  ;;  %v455_v2 = vsub.f32 (!%p1608_p5), 1.0, %v454_v0  ;;  %v892_v8 = vld [vmem:[%s1593_s8] ss:$0 sm:$0xff] (!%p1608_p5) }
  0x71   : > { %s443_s29 = scalar_lea.vmem %s1590_s5, %s1476_s20  ;;  %s446_s17 = scalar_lea.vmem %s1591_s6, %s1476_s20  ;;  %v458_v3 = vshrl.u32 (!%p1608_p5), %v457_v1, 7 }
  0x73   : > { %v459_v4 = vsub.s32 (!%p1608_p5), 0, %v458_v3 }
  0x75   : > { %v460_v7 = vrot.slane (!%p1608_p5), %v455_v2, %v459_v4 }
  0x77   : > { %v462_v9 = vmul.f32 %v460_v7, %v452_v5  ;;  %v463_v10 = vmul.f32 %v460_v7, %v453_v6 }
  0x79   : > { %v471_v11 = vadd.f32 %v892_v8, %v462_v9  ;;  %v472_v12 = vadd.f32 %v892_v8, %v463_v10 }
  0x7b   : > { %473 = vst [vmem:[#allocation2] sm:$0xff] %v471_v11  ;;  %474 = vst [vmem:[#allocation2 + $0x8] sm:$0xff] %v472_v12 }
  0x7c PF: > { %v1047_v13 = vld [vmem:[%s1468_s23] sm:$0xff]   ;;  %v1232_v14 = vmov 0.0   ;;  %v1048_v15 = vld [vmem:[%s1468_s23 + $0x8] sm:$0xff]   ;;  %vm1233_vm0 = vmmov 0   ;;  %v1049_v16 = vld [vmem:[%s1468_s23 + $0x10] sm:$0xff]   ;;  %v726_v59 = vlaneseq  ;;  %p912_p0 = scmp.ne.s32.totalorder %s1381_s24, 1 }
  0x7d   : > { %937 = vmatprep.subr.bf16.mxu0 %v1232_v14  ;;  %957 = vmatprep.subr.bf16.mxu1 %v1232_v14  ;;  %v1050_v17 = vld [vmem:[%s1468_s23 + $0x18] sm:$0xff]   ;;  %v1051_v18 = vld [vmem:[%s1468_s23 + $0x20] sm:$0xff]   ;;  %v1052_v19 = vld [vmem:[%s1468_s23 + $0x28] sm:$0xff]  }
  0x7e   : > { %938 = vmatpush3.bf16.msra.mxu0 %v1047_v13  ;;  %953 = vmatprep.mubr.msk.bf16.mxu0 %vm1233_vm0, %v1232_v14  ;;  %v1053_v20 = vld [vmem:[%s1468_s23 + $0x30] sm:$0xff]   ;;  %v1054_v21 = vld [vmem:[%s1468_s23 + $0x38] sm:$0xff]   ;;  %v1055_v25 = vld [vmem:[%s1494_s30] sm:$0xff]   ;;  %v727_v60 = vshrl.u32 %v726_v59, 7 }
  0x7f   : > { %939 = vmatprep.subr.bf16.mxu0 %v1232_v14  ;;  %973 = vmatprep.mubr.msk.bf16.mxu1 %vm1233_vm0, %v1232_v14  ;;  %v1056_v26 = vld [vmem:[%s1494_s30 + $0x8] sm:$0xff]   ;;  %v1057_v27 = vld [vmem:[%s1494_s30 + $0x10] sm:$0xff]   ;;  %v1058_v28 = vld [vmem:[%s1494_s30 + $0x18] sm:$0xff]  }
  0x80   : > { %958 = vmatpush3.bf16.msra.mxu1 %v1055_v25  ;;  %v1059_v29 = vld [vmem:[%s1494_s30 + $0x20] sm:$0xff]   ;;  %v1060_v30 = vld [vmem:[%s1494_s30 + $0x28] sm:$0xff]   ;;  %v1061_v31 = vld [vmem:[%s1494_s30 + $0x30] sm:$0xff]   ;;  %v728_v63 = vsub.s32 0, %v727_v60 }
  0x81   : > { %959 = vmatprep.subr.bf16.mxu1 %v1232_v14  ;;  %v1062_v32 = vld [vmem:[%s1494_s30 + $0x38] sm:$0xff]   ;;  %v893_v33 = vld [vmem:[%s437_s27] ss:$0 sm:$0xff] }
  0x82   : > { %940 = vmatpush3.bf16.msra.mxu0 %v1048_v15  ;;  %v1512_v22 = vld [vmem:[#allocation2] sm:$0xff]  ;;  %v1514_v23 = vld [vmem:[#allocation2 + $0x8] sm:$0xff] }
  0x83   : > { %941 = vmatprep.subr.bf16.mxu0 %v1232_v14  ;;  %v477_v24 = vpack.c.bf16 %v1514_v23, %v1512_v22  ;;  %v723_v61 = vld [vmem:[%s443_s29] sm:$0x1] }
  0x84   : > { %960 = vmatpush3.bf16.msra.mxu1 %v1056_v26  ;;  %v724_v62 = vsub.f32 1.0, %v723_v61  ;;  %v902_v0 = vld [vmem:[%s440_s21] ss:$0 sm:$0xff] }
  0x85   : > { %961 = vmatprep.subr.bf16.mxu1 %v1232_v14  ;;  %v911_v9 = vld [vmem:[%s446_s17] ss:$0 sm:$0xff] }
  0x86   : > { %942 = vmatpush3.bf16.msra.mxu0 %v1049_v16  ;;  %v729_v3 = vrot.slane %v724_v62, %v728_v63 }
  0x87   : > { %943 = vmatprep.subr.bf16.mxu0 %v1232_v14 }
  0x88   : > { %962 = vmatpush3.bf16.msra.mxu1 %v1057_v27 }
  0x89   : > { %963 = vmatprep.subr.bf16.mxu1 %v1232_v14 }
  0x8a   : > { %944 = vmatpush3.bf16.msra.mxu0 %v1050_v17 }
  0x8b   : > { %945 = vmatprep.subr.bf16.mxu0 %v1232_v14 }
  0x8c   : > { %964 = vmatpush3.bf16.msra.mxu1 %v1058_v28 }
  0x8d   : > { %965 = vmatprep.subr.bf16.mxu1 %v1232_v14 }
  0x8e   : > { %946 = vmatpush3.bf16.msra.mxu0 %v1051_v18 }
  0x8f   : > { %947 = vmatprep.subr.bf16.mxu0 %v1232_v14 }
  0x90   : > { %966 = vmatpush3.bf16.msra.mxu1 %v1059_v29 }
  0x91   : > { %967 = vmatprep.subr.bf16.mxu1 %v1232_v14 }
  0x92   : > { %948 = vmatpush3.bf16.msra.mxu0 %v1052_v19 }
  0x93   : > { %949 = vmatprep.subr.bf16.mxu0 %v1232_v14 }
  0x94   : > { %968 = vmatpush3.bf16.msra.mxu1 %v1060_v30 }
  0x95   : > { %969 = vmatprep.subr.bf16.mxu1 %v1232_v14 }
  0x96   : > { %950 = vmatpush3.bf16.msra.mxu0 %v1053_v20 }
  0x97   : > { %951 = vmatprep.subr.bf16.mxu0 %v1232_v14 }
  0x98   : > { %970 = vmatpush3.bf16.msra.mxu1 %v1061_v31 }
  0x99   : > { %971 = vmatprep.subr.bf16.mxu1 %v1232_v14 }
  0x9a   : > { %952 = vmatpush3.bf16.msra.mxu0 %v1054_v21 }
  0x9c   : > { %972 = vmatpush3.bf16.msra.mxu1 %v1062_v32 }
  0x9d   : > { %954 = vmatmul.mubr.bf16.vlgmr.msra.gmra.mrb[0].mxu0 %v477_v24 }
 0x170   : > { %v583_v34 = vpop.f32.mrb[0].mxu0 }
 0x171   : > { %v584_v35 = vadd.f32 %v893_v33, %v583_v34  ;;  %v955_v36 = vpop.f32.mrb[1].mxu0 }
 0x172   : > { %v586_v37 = vpop.f32.mrb[2].mxu0 }
 0x173   : > { %v590_v38 = vmul.f32 %v584_v35, %v584_v35  ;;  %v587_v39 = vadd.f32 %v893_v33, %v586_v37  ;;  %v956_v40 = vpop.f32.mrb[3].mxu0 }
 0x175   : > { %v592_v41 = vmul.f32 %v590_v38, %v584_v35  ;;  %v591_v42 = vmul.f32 %v587_v39, %v587_v39 }
 0x177   : > { %v594_v43 = vmul.f32 0.044715, %v592_v41  ;;  %v593_v44 = vmul.f32 %v591_v42, %v587_v39 }
 0x179   : > { %v596_v45 = vadd.f32 %v594_v43, %v584_v35  ;;  %v595_v46 = vmul.f32 0.044715, %v593_v44 }
 0x17b   : > { %v598_v47 = vmul.f32 0.7978846, %v596_v45  ;;  %v597_v48 = vadd.f32 %v595_v46, %v587_v39 }
 0x17d   : > { %1063 = vtanh.f32 %v598_v47  ;;  %v599_v49 = vmul.f32 0.7978846, %v597_v48 }
 0x17f   : > { %1065 = vtanh.f32 %v599_v49 }
 0x187   : > { %v1064_v50 = vpop.eup %1063 }
 0x188   : > { %v602_v51 = vadd.f32 1.0, %v1064_v50 }
 0x189   : > { %v1066_v52 = vpop.eup %1065 }
 0x18a   : > { %v603_v53 = vadd.f32 1.0, %v1066_v52  ;;  %v604_v54 = vmul.f32 0.5, %v602_v51 }
 0x18c   : > { %v605_v55 = vmul.f32 0.5, %v603_v53  ;;  %v606_v56 = vmul.f32 %v604_v54, %v584_v35 }
 0x18e   : > { %v607_v57 = vmul.f32 %v605_v55, %v587_v39 }
 0x190   : > { %v608_v58 = vpack.c.bf16 %v607_v57, %v606_v56 }
 0x192   : > { %974 = vmatmul.mubr.bf16.vlgmr.msra.gmra.mrb[0].mxu1 %v608_v58 }
 0x265   : > { %v714_v1 = vpop.f32.mrb[0].mxu1 }
 0x266   : > { %v715_v2 = vadd.f32 %v902_v0, %v714_v1  ;;  %v975_v4 = vpop.f32.mrb[1].mxu1 }
 0x267   : > { %v717_v5 = vpop.f32.mrb[2].mxu1 }
 0x268   : > { %v721_v6 = vadd.f32 %v715_v2, %v1512_v22  ;;  %v718_v7 = vadd.f32 %v902_v0, %v717_v5  ;;  %v976_v8 = vpop.f32.mrb[3].mxu1 }
 0x26a   : > { %v731_v10 = vmul.f32 %v729_v3, %v721_v6  ;;  %v722_v11 = vadd.f32 %v718_v7, %v1514_v23  ;;  %747 = sbr.rel (%p912_p0) target bundleno = 625 (0x271), region = 76 }
 0x26c   : > { %v740_v12 = vadd.f32 %v911_v9, %v731_v10  ;;  %v732_v13 = vmul.f32 %v729_v3, %v722_v11 }
 0x26e   : > { %742 = vst [vmem:[#allocation2] sm:$0xff] %v740_v12  ;;  %v741_v14 = vadd.f32 %v911_v9, %v732_v13  ;;  %748 = vst [vmem:[#allocation9] sm:$0xff] (!%p912_p0), %v740_v12 }
 0x270   : > { %743 = vst [vmem:[#allocation2 + $0x8] sm:$0xff] %v741_v14  ;;  %749 = vst [vmem:[#allocation9 + $0x8] sm:$0xff] (!%p912_p0), %v741_v14 }
 0x271 PF: > { %p1003_p6 = scmp.eq.s32.totalorder %s1381_s24, 1  ;;  %s1234_s21 = smov [#allocation9]  }
 0x272   : > { %s756_s20 = sshll.u32 %s1234_s21, 4  ;;  %s757_s20 = int_to_ptr.vmem [resolvable:$true] %s756_s20 }
 0x273   : > { %s1155_s29 = scalar_lea.vmem %s757_s20, 256  ;;  %p1162_p13 = scmp.lt.s32.totalorder %s757_s20, %s757_s20 }
 0x274   : > { %p1156_p8 = scmp.ne.s32.totalorder %s757_s20, %s1155_s29  ;;  %p1163_p7 = scmp.lt.s32.totalorder %s1155_s29, %s1155_s29 }
 0x276   : > { %p1157_p11 = pnand %p1156_p8, %p1003_p6  ;;  %p1164_p12 = por %p1163_p7, %p1162_p13 }
 0x278   : > { %p1158_p9 = pneg %p1157_p11 }
 0x27a   : > { %p1165_p2 = pnand %p1164_p12, %p1158_p9 }
 0x27c   : > { %1168 = shalt.err (!%p1165_p2)
}
 0x27d   : > { %s1169_s12 = scalar_lea.hbm %s1594_s9, 256 }
 0x27e   : > { %p1170_p4 = scmp.ne.s32.totalorder %s1594_s9, %s1169_s12  ;;  %p1175_p1 = scmp.lt.u32.totalorder %s1169_s12, %s1594_s9 }
 0x280   : > { %p1171_p10 = pnand %p1170_p4, %p1003_p6 }
 0x282   : > { %p1172_p3 = pneg %p1171_p10 }
 0x284   : > { %p1177_p5 = pnand %p1175_p1, %p1172_p3 }
 0x286   : > { %1180 = shalt.err (!%p1177_p5)
}
 0x287   : > { %s1235_s27 = smov 128   ;;  %s1236_s22 = smov 8  }
 0x288   : > { %986 = dma.vmem_to_hbm [thread:$0]  (%p1003_p6), %s757_s20, 256, %s1594_s9, [#allocation5], %s1235_s27, %s1235_s27, %s1236_s22  }
 0x289   : > { %1206 = dma.done.wait (%p1003_p6), [#allocation5], 256  }
 0x28a   : > { %1208 = vsyncadd (%p1003_p6), [#allocation5], 4294967040 }
 0x28b PF: > { %p21_p0 = scmp.ge.s32.totalorder %s1308_s13, 4   ;;  %s1609_s30 = smov %s1215_s10 }
 0x28c   : > { %s1610_s10 = smov %s1219_s11  ;;  %s1611_s11 = smov %s1318_s16 }
 0x28d   : > { %s1612_s12 = smov %s1308_s13  ;;  %23 = sbr.rel (!%p21_p0) target bundleno = 5 (0x5), region = 129 }
 0x294   :  { %772 = vsyncpa [#allocation4], 1 }
 0x295   :  { %774 = vsyncpa [#allocation4 + $0x1], 1 }
 0x296   :  { %775 = vsyncpa [#allocation7], 1 }
 0x297   :  { %777 = vsyncpa [#allocation7 + $0x1], 1 }
 0x298   :  { %778 = vsyncpa [#allocation5], 1 }
 0x299   :  { %780 = vsyncpa [#allocation5 + $0x1], 1 }

</bundles_post_ra>
